<compile_context>
chip_gen: v6e
topology: v6e:2x2x1
jax: 0.10.0
libtpu: 0.0.40
codegen_flags: <defaults>
</compile_context>

<pallas_src>
import functools

import jax
import jax.numpy as jnp
from jax.experimental import pallas as pl
from jax.experimental.pallas import tpu as pltpu

K = 3          # causal conv kernel size
LANE = 128     # TPU lane width
SUBLANE = 16   # safe sublane multiple for f32/bf16 batch tiles


def _round_up(x, m):
    return (x + m - 1) // m * m


# --------------------------------------------------------------------------------------
# Kernel: one grid step == one (TB, .) batch tile; three lane-dense MXU GEMMs.
# --------------------------------------------------------------------------------------
def sparknet_kernel(x_ref, wc_ref, bc_ref, w1_ref, b1_ref, w2_ref, b2_ref, out_ref):
    """x_ref: (TB, Fp) f32; weights in compute dtype (bf16 default); out: (TB, Np) f32."""
    cd = wc_ref.dtype
    xf = x_ref[...]                                                   # exact f32 input

    # ---- CasualResidual: causal Conv1d + ReLU + skip, as one GEMM on the flat layout.
    conv = jnp.dot(xf.astype(cd), wc_ref[...],
                   preferred_element_type=jnp.float32) + bc_ref[...]
    resid = jnp.maximum(conv, 0.0) + xf                               # f32 residual skip

    # ---- MultiLayerPerceptron: (TB,Fp)@(Fp,Hp) -> ReLU -> (TB,Hp)@(Hp,Np)
    h = jnp.dot(resid.astype(cd), w1_ref[...], preferred_element_type=jnp.float32)
    h = jnp.maximum(h + b1_ref[...], 0.0)
    o = jnp.dot(h.astype(cd), w2_ref[...], preferred_element_type=jnp.float32)
    out_ref[...] = (o + b2_ref[...]).astype(out_ref.dtype)


# --------------------------------------------------------------------------------------
# One-time parameter packing (hoisted out of the per-forward path).
# --------------------------------------------------------------------------------------
def _causal_conv_operator(wc_kcc, C, S):
    """Fold the causal k=3 conv into a dense (C*S, C*S) matrix.

    Wc[ci*S+si, co*S+so] = wc[K-1-(so-si), co, ci] if 0 <= so-si <= K-1 else 0,
    so that conv_flat = x_flat @ Wc reproduces Conv1d with (K-1) left padding.
    """
    si = jnp.arange(S)
    so = jnp.arange(S)
    d = so[None, :] - si[:, None]                      # (S_in, S_out)
    valid = (d >= 0) & (d <= K - 1)
    kidx = jnp.clip(K - 1 - d, 0, K - 1)
    wk = wc_kcc[kidx]                                  # (S_in, S_out, C_out, C_in)
    m = jnp.where(valid[:, :, None, None], wk, 0.0)
    m = jnp.transpose(m, (3, 0, 2, 1))                 # (C_in, S_in, C_out, S_out)
    return m.reshape(C * S, C * S)


def pack_sparknet_params(wc_kcc, bc, w1, b1, w2, b2, input_shape,
                         compute_dtype=jnp.bfloat16):
    """Build lane-dense, zero-padded, pre-cast parameters. Call once; reuse per forward."""
    C, S = input_shape
    F = C * S
    H = w1.shape[1]
    N = w2.shape[1]
    Fp, Hp, Np = _round_up(F, LANE), _round_up(H, LANE), _round_up(N, LANE)

    wc_mat = jnp.pad(_causal_conv_operator(wc_kcc.astype(jnp.float32), C, S),
                     ((0, Fp - F), (0, Fp - F))).astype(compute_dtype)
    bc_flat = jnp.pad(jnp.repeat(bc.reshape(C).astype(jnp.float32), S),
                      (0, Fp - F)).reshape(1, Fp)
    w1_p = jnp.pad(w1.astype(jnp.float32), ((0, Fp - F), (0, Hp - H))).astype(compute_dtype)
    b1_p = jnp.pad(b1.reshape(1, H).astype(jnp.float32), ((0, 0), (0, Hp - H)))
    w2_p = jnp.pad(w2.astype(jnp.float32), ((0, Hp - H), (0, Np - N))).astype(compute_dtype)
    b2_p = jnp.pad(b2.reshape(1, N).astype(jnp.float32), ((0, 0), (0, Np - N)))
    return (wc_mat, bc_flat, w1_p, b1_p, w2_p, b2_p)


# --------------------------------------------------------------------------------------
# Tiling / VMEM sizing.
# --------------------------------------------------------------------------------------
def _choose_batch_tiling(B, max_batch_tile):
    """Pick (TB, Bp): minimize padding, aim for >=2 grid steps (2 TCs) when B allows."""
    Bp16 = _round_up(max(B, 1), SUBLANE)
    if Bp16 <= 2 * SUBLANE:                 # tiny batch: one step, grid adds nothing
        return Bp16, Bp16
    n_steps = max(2, pl.cdiv(Bp16, max_batch_tile))
    TB = min(_round_up(pl.cdiv(Bp16, n_steps), SUBLANE), max_batch_tile)
    return TB, _round_up(Bp16, TB)


def _vmem_limit_bytes(TB, Fp, Hp, Np, weight_itemsize, weight_bufs):
    """Derive the VMEM limit from actual buffer sizes (instead of a hard-coded 32 MiB)."""
    weights = weight_bufs * (Fp * Fp + Fp * Hp + Hp * Np) * weight_itemsize
    biases = weight_bufs * 8 * (Fp + Hp + Np) * 4          # (1, lane) pads to (8, lane) f32
    io = 2 * TB * Fp * 4 + 2 * TB * Np * 4                 # double-buffered x / out tiles
    interm = 2 * TB * (Fp + Hp + Np) * 4                   # live f32 intermediates
    need = weights + biases + io + interm
    return max(32 << 20, min(int(need * 1.25) + (4 << 20), 100 << 20))


# --------------------------------------------------------------------------------------
# Forward wrapper.
# --------------------------------------------------------------------------------------
@functools.partial(jax.jit,
                   static_argnames=("target_shape", "max_batch_tile", "single_buffer_weights"))
def _sparknet_forward_impl(x, params, target_shape, max_batch_tile, single_buffer_weights):
    wc_mat, bc_flat, w1_p, b1_p, w2_p, b2_p = params
    B, C, S = x.shape
    Ct, St = target_shape
    F, N = C * S, Ct * St
    Fp, Hp, Np = wc_mat.shape[0], w1_p.shape[1], w2_p.shape[1]

    TB, Bp = _choose_batch_tiling(B, max_batch_tile)
    x_flat = jnp.pad(x.reshape(B, F).astype(jnp.float32), ((0, Bp - B), (0, Fp - F)))

    def const(shape):
        # Grid-invariant operand: fetched once; single-buffer to halve weight VMEM.
        if single_buffer_weights:
            return pl.BlockSpec(shape, lambda i: (0,) * len(shape),
                                pipeline_mode=pl.Buffered(1))
        return pl.BlockSpec(shape, lambda i: (0,) * len(shape))

    weight_bufs = 1 if single_buffer_weights else 2
    out_p = pl.pallas_call(
        sparknet_kernel,
        out_shape=jax.ShapeDtypeStruct((Bp, Np), jnp.float32),
        grid=(Bp // TB,),
        in_specs=[
            pl.BlockSpec((TB, Fp), lambda i: (i, 0)),   # x batch tile (f32)
            const((Fp, Fp)),                            # dense causal-conv operator
            const((1, Fp)),                             # conv bias
            const((Fp, Hp)),                            # W1
            const((1, Hp)),                             # b1
            const((Hp, Np)),                            # W2
            const((1, Np)),                             # b2
        ],
        out_specs=pl.BlockSpec((TB, Np), lambda i: (i, 0)),
        compiler_params=pltpu.CompilerParams(
            dimension_semantics=("parallel",),
            vmem_limit_bytes=_vmem_limit_bytes(TB, Fp, Hp, Np,
                                               wc_mat.dtype.itemsize, weight_bufs),
        ),
    )(x_flat, wc_mat, bc_flat, w1_p, b1_p, w2_p, b2_p)

    # Un-pad batch / output columns and restore (B, Ct, St).
    return out_p[:B, :N].reshape(B, Ct, St)


def sparknet_forward(x, params, target_shape, max_batch_tile=256):
    try:
        return _sparknet_forward_impl(x, params, target_shape, max_batch_tile, True)
    except Exception:
        # Fallback if single-buffered (Buffered(1)) grid-invariant specs are unsupported.
        return _sparknet_forward_impl(x, params, target_shape, max_batch_tile, False)


# --------------------------------------------------------------------------------------
# Pure-JAX reference (mirrors the PyTorch forward).
# --------------------------------------------------------------------------------------
def sparknet_ref(x, wc_kcc, bc, w1, b1, w2, b2, target_shape):
    B, C, S = x.shape
    Ct, St = target_shape
    w_oik = jnp.transpose(wc_kcc, (1, 2, 0))                      # (C_out, C_in, K)
    xp = jnp.pad(x, ((0, 0), (0, 0), (K - 1, 0)))                 # causal left pad
    conv = jax.lax.conv_general_dilated(
        xp, w_oik, window_strides=(1,), padding="VALID",
        dimension_numbers=("NCH", "OIH", "NCH"),
    ) + bc.reshape(1, C, 1)
    resid = jnp.maximum(conv, 0.0) + x
    flat = resid.reshape(B, C * S)
    h = jnp.maximum(flat @ w1 + b1, 0.0)
    o = h @ w2 + b2
    return o.reshape(B, Ct, St)


if __name__ == "__main__":
    # Small shapes consistent with SparkNet(input_shape=(B,C,S), target_shape=(B,Ct,St))
    B, C, S = 2, 4, 16          # input_shape
    Ct, St = 2, 8               # target_shape (channels, sequence)
    H = 100                     # MLP hidden width from the module definition

    key = jax.random.PRNGKey(0)
    kx, kwc, kbc, kw1, kb1, kw2, kb2 = jax.random.split(key, 7)

    x = jax.random.normal(kx, (B, C, S), jnp.float32)
    wc_kcc = jax.random.normal(kwc, (K, C, C), jnp.float32) * 0.3   # causal conv weight
    bc = jax.random.normal(kbc, (C, 1), jnp.float32) * 0.1
    w1 = jax.random.normal(kw1, (C * S, H), jnp.float32) * 0.1
    b1 = jax.random.normal(kb1, (1, H), jnp.float32) * 0.1
    w2 = jax.random.normal(kw2, (H, Ct * St), jnp.float32) * 0.1
    b2 = jax.random.normal(kb2, (1, Ct * St), jnp.float32) * 0.1

    ref = sparknet_ref(x, wc_kcc, bc, w1, b1, w2, b2, (Ct, St))

    # f32-weight path: strict correctness check against the reference.
    params_f32 = pack_sparknet_params(wc_kcc, bc, w1, b1, w2, b2, (C, S),
                                      compute_dtype=jnp.float32)
    out_f32 = jax.block_until_ready(sparknet_forward(x, params_f32, (Ct, St)))
    assert out_f32.shape == (B, Ct, St), out_f32.shape
    assert jnp.allclose(out_f32, ref, atol=1e-4, rtol=1e-4), \
        float(jnp.max(jnp.abs(out_f32 - ref)))

    # Default bf16-weight path (MXU-native); exact f32 residual skip, f32 accumulation.
    params_bf16 = pack_sparknet_params(wc_kcc, bc, w1, b1, w2, b2, (C, S))
    out_bf16 = jax.block_until_ready(sparknet_forward(x, params_bf16, (Ct, St)))
    assert out_bf16.shape == (B, Ct, St), out_bf16.shape
    assert jnp.allclose(out_bf16, ref, atol=1.5e-1, rtol=1e-1), \
        float(jnp.max(jnp.abs(out_bf16 - ref)))

    print("KERNEL_OK")
</pallas_src>

<mosaic_0001>
module attributes {stable_mosaic.version = 11 : i64} {
  func.func @sparknet_kernel(%arg0: i32, %arg1: memref<16x128xf32, #tpu.memory_space<vmem>>, %arg2: memref<128x128xf32, #tpu.memory_space<vmem>>, %arg3: memref<1x128xf32, #tpu.memory_space<vmem>>, %arg4: memref<128x128xf32, #tpu.memory_space<vmem>>, %arg5: memref<1x128xf32, #tpu.memory_space<vmem>>, %arg6: memref<128x128xf32, #tpu.memory_space<vmem>>, %arg7: memref<1x128xf32, #tpu.memory_space<vmem>>, %arg8: memref<16x128xf32, #tpu.memory_space<vmem>>) attributes {dimension_semantics = [#tpu.dimension_semantics<parallel>], iteration_bounds = array<i64: 1>, scalar_prefetch = 0 : i64, scratch_operands = 0 : i64, tpu.core_type = #tpu.core_type<tc>, window_params = [{transform_indices = @transform_0, window_bounds = array<i64: 16, 128>}, {pipeline_mode = #tpu.pipeline_mode<synchronous>, transform_indices = @transform_1, window_bounds = array<i64: 128, 128>}, {pipeline_mode = #tpu.pipeline_mode<synchronous>, transform_indices = @transform_2, window_bounds = array<i64: 1, 128>}, {pipeline_mode = #tpu.pipeline_mode<synchronous>, transform_indices = @transform_3, window_bounds = array<i64: 128, 128>}, {pipeline_mode = #tpu.pipeline_mode<synchronous>, transform_indices = @transform_4, window_bounds = array<i64: 1, 128>}, {pipeline_mode = #tpu.pipeline_mode<synchronous>, transform_indices = @transform_5, window_bounds = array<i64: 128, 128>}, {pipeline_mode = #tpu.pipeline_mode<synchronous>, transform_indices = @transform_6, window_bounds = array<i64: 1, 128>}, {transform_indices = @transform_7, window_bounds = array<i64: 16, 128>}]} {
    %c0 = arith.constant 0 : index
    %c0_0 = arith.constant 0 : index
    %0 = vector.load %arg1[%c0, %c0_0] : memref<16x128xf32, #tpu.memory_space<vmem>>, vector<16x128xf32>
    %c0_1 = arith.constant 0 : index
    %c0_2 = arith.constant 0 : index
    %1 = vector.load %arg2[%c0_1, %c0_2] : memref<128x128xf32, #tpu.memory_space<vmem>>, vector<128x128xf32>
    %cst = arith.constant dense<0.000000e+00> : vector<16x128xf32>
    %2 = tpu.matmul %0, %1, %cst {dimension_numbers = #tpu.dot_dimension_numbers<[1], [0], [0], [1], [0, 0, 1, 1], [], []>} : vector<16x128xf32>, vector<128x128xf32>, vector<16x128xf32> -> vector<16x128xf32>
    %c0_3 = arith.constant 0 : index
    %c0_4 = arith.constant 0 : index
    %3 = vector.load %arg3[%c0_3, %c0_4] : memref<1x128xf32, #tpu.memory_space<vmem>>, vector<1x128xf32>
    %4 = vector.broadcast %3 : vector<1x128xf32> to vector<16x128xf32>
    %5 = arith.addf %2, %4 : vector<16x128xf32>
    %cst_5 = arith.constant 0.000000e+00 : f32
    %6 = vector.broadcast %cst_5 : f32 to vector<16x128xf32>
    %7 = arith.maximumf %5, %6 : vector<16x128xf32>
    %8 = arith.addf %7, %0 : vector<16x128xf32>
    %c0_6 = arith.constant 0 : index
    %c0_7 = arith.constant 0 : index
    %9 = vector.load %arg4[%c0_6, %c0_7] : memref<128x128xf32, #tpu.memory_space<vmem>>, vector<128x128xf32>
    %cst_8 = arith.constant dense<0.000000e+00> : vector<16x128xf32>
    %10 = tpu.matmul %8, %9, %cst_8 {dimension_numbers = #tpu.dot_dimension_numbers<[1], [0], [0], [1], [0, 0, 1, 1], [], []>} : vector<16x128xf32>, vector<128x128xf32>, vector<16x128xf32> -> vector<16x128xf32>
    %c0_9 = arith.constant 0 : index
    %c0_10 = arith.constant 0 : index
    %11 = vector.load %arg5[%c0_9, %c0_10] : memref<1x128xf32, #tpu.memory_space<vmem>>, vector<1x128xf32>
    %12 = vector.broadcast %11 : vector<1x128xf32> to vector<16x128xf32>
    %13 = arith.addf %10, %12 : vector<16x128xf32>
    %cst_11 = arith.constant 0.000000e+00 : f32
    %14 = vector.broadcast %cst_11 : f32 to vector<16x128xf32>
    %15 = arith.maximumf %13, %14 : vector<16x128xf32>
    %c0_12 = arith.constant 0 : index
    %c0_13 = arith.constant 0 : index
    %16 = vector.load %arg6[%c0_12, %c0_13] : memref<128x128xf32, #tpu.memory_space<vmem>>, vector<128x128xf32>
    %cst_14 = arith.constant dense<0.000000e+00> : vector<16x128xf32>
    %17 = tpu.matmul %15, %16, %cst_14 {dimension_numbers = #tpu.dot_dimension_numbers<[1], [0], [0], [1], [0, 0, 1, 1], [], []>} : vector<16x128xf32>, vector<128x128xf32>, vector<16x128xf32> -> vector<16x128xf32>
    %c0_15 = arith.constant 0 : index
    %c0_16 = arith.constant 0 : index
    %18 = vector.load %arg7[%c0_15, %c0_16] : memref<1x128xf32, #tpu.memory_space<vmem>>, vector<1x128xf32>
    %19 = vector.broadcast %18 : vector<1x128xf32> to vector<16x128xf32>
    %20 = arith.addf %17, %19 : vector<16x128xf32>
    %c0_17 = arith.constant 0 : index
    %c0_18 = arith.constant 0 : index
    %21 = vector.load %arg8[%c0_17, %c0_18] : memref<16x128xf32, #tpu.memory_space<vmem>>, vector<16x128xf32>
    tpu.vector_store %arg8[%c0_17, %c0_18], %20 {strides = array<i32>} : memref<16x128xf32, #tpu.memory_space<vmem>>, vector<16x128xf32>,
    return
  }
  func.func @transform_0(%arg0: i32) -> (i32, i32) {
    %c0_i32 = arith.constant 0 : i32
    %c0_i32_0 = arith.constant 0 : i32
    return %arg0, %c0_i32 : i32, i32
  }
  func.func @transform_1(%arg0: i32) -> (i32, i32) {
    %c0_i32 = arith.constant 0 : i32
    %c0_i32_0 = arith.constant 0 : i32
    %c0_i32_1 = arith.constant 0 : i32
    return %c0_i32, %c0_i32_0 : i32, i32
  }
  func.func @transform_2(%arg0: i32) -> (i32, i32) {
    %c0_i32 = arith.constant 0 : i32
    %c0_i32_0 = arith.constant 0 : i32
    %c0_i32_1 = arith.constant 0 : i32
    return %c0_i32, %c0_i32_0 : i32, i32
  }
  func.func @transform_3(%arg0: i32) -> (i32, i32) {
    %c0_i32 = arith.constant 0 : i32
    %c0_i32_0 = arith.constant 0 : i32
    %c0_i32_1 = arith.constant 0 : i32
    return %c0_i32, %c0_i32_0 : i32, i32
  }
  func.func @transform_4(%arg0: i32) -> (i32, i32) {
    %c0_i32 = arith.constant 0 : i32
    %c0_i32_0 = arith.constant 0 : i32
    %c0_i32_1 = arith.constant 0 : i32
    return %c0_i32, %c0_i32_0 : i32, i32
  }
  func.func @transform_5(%arg0: i32) -> (i32, i32) {
    %c0_i32 = arith.constant 0 : i32
    %c0_i32_0 = arith.constant 0 : i32
    %c0_i32_1 = arith.constant 0 : i32
    return %c0_i32, %c0_i32_0 : i32, i32
  }
  func.func @transform_6(%arg0: i32) -> (i32, i32) {
    %c0_i32 = arith.constant 0 : i32
    %c0_i32_0 = arith.constant 0 : i32
    %c0_i32_1 = arith.constant 0 : i32
    return %c0_i32, %c0_i32_0 : i32, i32
  }
  func.func @transform_7(%arg0: i32) -> (i32, i32) {
    %c0_i32 = arith.constant 0 : i32
    %c0_i32_0 = arith.constant 0 : i32
    return %arg0, %c0_i32 : i32, i32
  }
}

module attributes {stable_mosaic.version = 11 : i64} {
  func.func @sparknet_kernel(%arg0: i32, %arg1: memref<16x128xf32, #tpu.memory_space<vmem>>, %arg2: memref<128x128xf32, #tpu.memory_space<vmem>>, %arg3: memref<1x128xf32, #tpu.memory_space<vmem>>, %arg4: memref<128x128xf32, #tpu.memory_space<vmem>>, %arg5: memref<1x128xf32, #tpu.memory_space<vmem>>, %arg6: memref<128x128xf32, #tpu.memory_space<vmem>>, %arg7: memref<1x128xf32, #tpu.memory_space<vmem>>, %arg8: memref<16x128xf32, #tpu.memory_space<vmem>>) attributes {dimension_semantics = [#tpu.dimension_semantics<parallel>], iteration_bounds = array<i64: 1>, scalar_prefetch = 0 : i64, scratch_operands = 0 : i64, tpu.core_type = #tpu.core_type<tc>, window_params = [{transform_indices = @transform_0, window_bounds = array<i64: 16, 128>}, {pipeline_mode = #tpu.pipeline_mode<synchronous>, transform_indices = @transform_1, window_bounds = array<i64: 128, 128>}, {pipeline_mode = #tpu.pipeline_mode<synchronous>, transform_indices = @transform_2, window_bounds = array<i64: 1, 128>}, {pipeline_mode = #tpu.pipeline_mode<synchronous>, transform_indices = @transform_3, window_bounds = array<i64: 128, 128>}, {pipeline_mode = #tpu.pipeline_mode<synchronous>, transform_indices = @transform_4, window_bounds = array<i64: 1, 128>}, {pipeline_mode = #tpu.pipeline_mode<synchronous>, transform_indices = @transform_5, window_bounds = array<i64: 128, 128>}, {pipeline_mode = #tpu.pipeline_mode<synchronous>, transform_indices = @transform_6, window_bounds = array<i64: 1, 128>}, {transform_indices = @transform_7, window_bounds = array<i64: 16, 128>}]} {
    %c0 = arith.constant 0 : index
    %c0_0 = arith.constant 0 : index
    %0 = vector.load %arg1[%c0, %c0_0] : memref<16x128xf32, #tpu.memory_space<vmem>>, vector<16x128xf32>
    %c0_1 = arith.constant 0 : index
    %c0_2 = arith.constant 0 : index
    %1 = vector.load %arg2[%c0_1, %c0_2] : memref<128x128xf32, #tpu.memory_space<vmem>>, vector<128x128xf32>
    %cst = arith.constant dense<0.000000e+00> : vector<16x128xf32>
    %2 = tpu.matmul %0, %1, %cst {dimension_numbers = #tpu.dot_dimension_numbers<[1], [0], [0], [1], [0, 0, 1, 1], [], []>} : vector<16x128xf32>, vector<128x128xf32>, vector<16x128xf32> -> vector<16x128xf32>
    %c0_3 = arith.constant 0 : index
    %c0_4 = arith.constant 0 : index
    %3 = vector.load %arg3[%c0_3, %c0_4] : memref<1x128xf32, #tpu.memory_space<vmem>>, vector<1x128xf32>
    %4 = vector.broadcast %3 : vector<1x128xf32> to vector<16x128xf32>
    %5 = arith.addf %2, %4 : vector<16x128xf32>
    %cst_5 = arith.constant 0.000000e+00 : f32
    %6 = vector.broadcast %cst_5 : f32 to vector<16x128xf32>
    %7 = arith.maximumf %5, %6 : vector<16x128xf32>
    %8 = arith.addf %7, %0 : vector<16x128xf32>
    %c0_6 = arith.constant 0 : index
    %c0_7 = arith.constant 0 : index
    %9 = vector.load %arg4[%c0_6, %c0_7] : memref<128x128xf32, #tpu.memory_space<vmem>>, vector<128x128xf32>
    %cst_8 = arith.constant dense<0.000000e+00> : vector<16x128xf32>
    %10 = tpu.matmul %8, %9, %cst_8 {dimension_numbers = #tpu.dot_dimension_numbers<[1], [0], [0], [1], [0, 0, 1, 1], [], []>} : vector<16x128xf32>, vector<128x128xf32>, vector<16x128xf32> -> vector<16x128xf32>
    %c0_9 = arith.constant 0 : index
    %c0_10 = arith.constant 0 : index
    %11 = vector.load %arg5[%c0_9, %c0_10] : memref<1x128xf32, #tpu.memory_space<vmem>>, vector<1x128xf32>
    %12 = vector.broadcast %11 : vector<1x128xf32> to vector<16x128xf32>
    %13 = arith.addf %10, %12 : vector<16x128xf32>
    %cst_11 = arith.constant 0.000000e+00 : f32
    %14 = vector.broadcast %cst_11 : f32 to vector<16x128xf32>
    %15 = arith.maximumf %13, %14 : vector<16x128xf32>
    %c0_12 = arith.constant 0 : index
    %c0_13 = arith.constant 0 : index
    %16 = vector.load %arg6[%c0_12, %c0_13] : memref<128x128xf32, #tpu.memory_space<vmem>>, vector<128x128xf32>
    %cst_14 = arith.constant dense<0.000000e+00> : vector<16x128xf32>
    %17 = tpu.matmul %15, %16, %cst_14 {dimension_numbers = #tpu.dot_dimension_numbers<[1], [0], [0], [1], [0, 0, 1, 1], [], []>} : vector<16x128xf32>, vector<128x128xf32>, vector<16x128xf32> -> vector<16x128xf32>
    %c0_15 = arith.constant 0 : index
    %c0_16 = arith.constant 0 : index
    %18 = vector.load %arg7[%c0_15, %c0_16] : memref<1x128xf32, #tpu.memory_space<vmem>>, vector<1x128xf32>
    %19 = vector.broadcast %18 : vector<1x128xf32> to vector<16x128xf32>
    %20 = arith.addf %17, %19 : vector<16x128xf32>
    %c0_17 = arith.constant 0 : index
    %c0_18 = arith.constant 0 : index
    %21 = vector.load %arg8[%c0_17, %c0_18] : memref<16x128xf32, #tpu.memory_space<vmem>>, vector<16x128xf32>
    tpu.vector_store %arg8[%c0_17, %c0_18], %20 {strides = array<i32>} : memref<16x128xf32, #tpu.memory_space<vmem>>, vector<16x128xf32>,
    return
  }
  func.func @transform_0(%arg0: i32) -> (i32, i32) {
    %c0_i32 = arith.constant 0 : i32
    %c0_i32_0 = arith.constant 0 : i32
    return %arg0, %c0_i32 : i32, i32
  }
  func.func @transform_1(%arg0: i32) -> (i32, i32) {
    %c0_i32 = arith.constant 0 : i32
    %c0_i32_0 = arith.constant 0 : i32
    %c0_i32_1 = arith.constant 0 : i32
    return %c0_i32, %c0_i32_0 : i32, i32
  }
  func.func @transform_2(%arg0: i32) -> (i32, i32) {
    %c0_i32 = arith.constant 0 : i32
    %c0_i32_0 = arith.constant 0 : i32
    %c0_i32_1 = arith.constant 0 : i32
    return %c0_i32, %c0_i32_0 : i32, i32
  }
  func.func @transform_3(%arg0: i32) -> (i32, i32) {
    %c0_i32 = arith.constant 0 : i32
    %c0_i32_0 = arith.constant 0 : i32
    %c0_i32_1 = arith.constant 0 : i32
    return %c0_i32, %c0_i32_0 : i32, i32
  }
  func.func @transform_4(%arg0: i32) -> (i32, i32) {
    %c0_i32 = arith.constant 0 : i32
    %c0_i32_0 = arith.constant 0 : i32
    %c0_i32_1 = arith.constant 0 : i32
    return %c0_i32, %c0_i32_0 : i32, i32
  }
  func.func @transform_5(%arg0: i32) -> (i32, i32) {
    %c0_i32 = arith.constant 0 : i32
    %c0_i32_0 = arith.constant 0 : i32
    %c0_i32_1 = arith.constant 0 : i32
    return %c0_i32, %c0_i32_0 : i32, i32
  }
  func.func @transform_6(%arg0: i32) -> (i32, i32) {
    %c0_i32 = arith.constant 0 : i32
    %c0_i32_0 = arith.constant 0 : i32
    %c0_i32_1 = arith.constant 0 : i32
    return %c0_i32, %c0_i32_0 : i32, i32
  }
  func.func @transform_7(%arg0: i32) -> (i32, i32) {
    %c0_i32 = arith.constant 0 : i32
    %c0_i32_0 = arith.constant 0 : i32
    return %arg0, %c0_i32 : i32, i32
  }
}

</mosaic_0001>

<bundles_post_ra>
// kernel: _sparknet_forward_impl.1
= control target key start
LH: loop header
LB: loop body
LE: loop exit
PB: predicated region body
PF: predicated region fallthrough
CT: control target
= control target key end

     0   :  { %12 = vsyncpa [#allocation3], 0  ;;  %s691_s0 = inlined_call_operand.vmem [shape: f32[16,128], index: 0, kind: input, shape index: {}]   ;;  %s692_s1 = inlined_call_operand.hbm [shape: f32[128,128], index: 1, kind: input, shape index: {}]   ;;  %s693_s2 = inlined_call_operand.vmem [shape: f32[1,128], index: 2, kind: input, shape index: {}]   ;;  %s694_s3 = inlined_call_operand.hbm [shape: f32[128,128], index: 3, kind: input, shape index: {}]   ;;  %s695_s4 = inlined_call_operand.vmem [shape: f32[1,128], index: 4, kind: input, shape index: {}]   ;;  %s696_s5 = inlined_call_operand.hbm [shape: f32[128,128], index: 5, kind: input, shape index: {}]   ;;  %s697_s6 = inlined_call_operand.vmem [shape: f32[1,128], index: 6, kind: input, shape index: {}]   ;;  %s698_s7 = inlined_call_operand.vmem [shape: f32[16,128], index: 7, kind: output, shape index: {}]  }
   0x1   :  { %13 = vsyncpa [#allocation5], 0  ;;  %s608_s24 = smov [#allocation4]   ;;  %s609_s26 = smov [#allocation2]  }
   0x2   :  { %s35_s25 = sshll.u32 %s608_s24, 4  ;;  %s21_s27 = sshll.u32 %s609_s26, 4  ;;  %s36_s25 = int_to_ptr.vmem [resolvable:$true] %s35_s25  ;;  %s22_s27 = int_to_ptr.vmem [resolvable:$true] %s21_s27 }
   0x3   :  { %s552_s28 = scalar_lea.vmem %s36_s25, 2048  ;;  %p557_p1 = scmp.lt.s32.totalorder %s36_s25, %s36_s25 }
   0x4   :  { %p553_p0 = scmp.ne.s32.totalorder %s36_s25, %s552_s28  ;;  %p558_p2 = scmp.lt.s32.totalorder %s552_s28, %s552_s28 }
   0x6   :  { %p559_p3 = por %p558_p2, %p557_p1 }
   0x8   :  { %p560_p4 = pnand %p559_p3, %p553_p0 }
   0xa   :  { %563 = shalt.err (!%p560_p4)
}
   0xb   :  { %s610_s29 = smov 128   ;;  %s611_s30 = smov 8  }
   0xc   :  { %41 = dma.hbm_to_vmem [thread:$0]  %s694_s3, 2048, %s36_s25, [#allocation5], %s610_s29, %s610_s29, %s611_s30  }
   0xd   :  { %s572_s10 = scalar_lea.vmem %s22_s27, 2048  ;;  %p577_p6 = scmp.lt.s32.totalorder %s22_s27, %s22_s27 }
   0xe   :  { %p573_p5 = scmp.ne.s32.totalorder %s22_s27, %s572_s10  ;;  %p578_p7 = scmp.lt.s32.totalorder %s572_s10, %s572_s10 }
  0x10   :  { %p579_p8 = por %p578_p7, %p577_p6 }
  0x12   :  { %p580_p9 = pnand %p579_p8, %p573_p5 }
  0x14   :  { %583 = shalt.err (!%p580_p9)
}
  0x15   :  { %27 = dma.hbm_to_vmem [thread:$0]  %s692_s1, 2048, %s22_s27, [#allocation3], %s610_s29, %s610_s29, %s611_s30  }
  0x16   :  { %s612_s13 = smov [#allocation6]  }
  0x17   :  { %s49_s14 = sshll.u32 %s612_s13, 4  ;;  %s50_s14 = int_to_ptr.vmem [resolvable:$true] %s49_s14 }
  0x18   :  { %s592_s15 = scalar_lea.vmem %s50_s14, 2048  ;;  %p597_p11 = scmp.lt.s32.totalorder %s50_s14, %s50_s14 }
  0x19   :  { %p593_p10 = scmp.ne.s32.totalorder %s50_s14, %s592_s15  ;;  %p598_p12 = scmp.lt.s32.totalorder %s592_s15, %s592_s15 }
  0x1b   :  { %p599_p13 = por %p598_p12, %p597_p11 }
  0x1d   :  { %p600_p0 = pnand %p599_p13, %p593_p10 }
  0x1f   :  { %603 = shalt.err (!%p600_p0)
}
  0x20   :  { %55 = dma.hbm_to_vmem [thread:$0]  %s696_s5, 2048, %s50_s14, [#allocation5], %s610_s29, %s610_s29, %s611_s30  }
  0x21   :  { %604 = dma.done.wait [#allocation3], 2048  }
  0x22   :  { %605 = vsyncadd [#allocation3], 4294965248 }
  0x23   :  { %606 = dma.done.wait [#allocation5], 4096  }
  0x24   :  { %607 = vsyncadd [#allocation5], 4294963200  ;;  %v84_v0 = vld [vmem:[#allocation2 + $0x78] sm:$0xff]  ;;  %v83_v1 = vld [vmem:[#allocation2 + $0x70] sm:$0xff] }
  0x25   :  { %434 = vmatprep.subr.mxu0 %v84_v0  ;;  %v82_v2 = vld [vmem:[#allocation2 + $0x68] sm:$0xff]  ;;  %v81_v3 = vld [vmem:[#allocation2 + $0x60] sm:$0xff]  ;;  %v80_v5 = vld [vmem:[#allocation2 + $0x58] sm:$0xff] }
  0x26   :  { %435 = vmatpush3.msra.mxu0 %v84_v0  ;;  %v665_v4 = vld [vmem:[%s691_s0] sm:$0xff]  ;;  %v186_v6 = vld [vmem:[#allocation4 + $0x78] sm:$0xff]  ;;  %v185_v7 = vld [vmem:[#allocation4 + $0x70] sm:$0xff] }
  0x27   :  { %436 = vmatprep.subr.mxu0 %v83_v1  ;;  %466 = vmatprep.mubr.f32.mxu0 %v665_v4  ;;  %v79_v8 = vld [vmem:[#allocation2 + $0x50] sm:$0xff]  ;;  %v184_v9 = vld [vmem:[#allocation4 + $0x68] sm:$0xff]  ;;  %v183_v11 = vld [vmem:[#allocation4 + $0x60] sm:$0xff] }
  0x28   :  { %437 = vmatpush3.msra.mxu0 %v83_v1  ;;  %469 = vmatprep.subr.mxu1 %v186_v6  ;;  %v78_v10 = vld [vmem:[#allocation2 + $0x48] sm:$0xff]  ;;  %v77_v12 = vld [vmem:[#allocation2 + $0x40] sm:$0xff]  ;;  %v182_v13 = vld [vmem:[#allocation4 + $0x58] sm:$0xff] }
  0x29   :  { %438 = vmatprep.subr.mxu0 %v82_v2  ;;  %470 = vmatpush3.msra.mxu1 %v186_v6  ;;  %v76_v14 = vld [vmem:[#allocation2 + $0x38] sm:$0xff]  ;;  %v181_v15 = vld [vmem:[#allocation4 + $0x50] sm:$0xff]  ;;  %v180_v17 = vld [vmem:[#allocation4 + $0x48] sm:$0xff] }
  0x2a   :  { %439 = vmatpush3.msra.mxu0 %v82_v2  ;;  %471 = vmatprep.subr.mxu1 %v185_v7  ;;  %v75_v16 = vld [vmem:[#allocation2 + $0x30] sm:$0xff]  ;;  %v74_v18 = vld [vmem:[#allocation2 + $0x28] sm:$0xff]  ;;  %v179_v19 = vld [vmem:[#allocation4 + $0x40] sm:$0xff] }
  0x2b   :  { %440 = vmatprep.subr.mxu0 %v81_v3  ;;  %472 = vmatpush3.msra.mxu1 %v185_v7  ;;  %v73_v20 = vld [vmem:[#allocation2 + $0x20] sm:$0xff]  ;;  %v178_v21 = vld [vmem:[#allocation4 + $0x38] sm:$0xff]  ;;  %v177_v23 = vld [vmem:[#allocation4 + $0x30] sm:$0xff] }
  0x2c   :  { %441 = vmatpush3.msra.mxu0 %v81_v3  ;;  %473 = vmatprep.subr.mxu1 %v184_v9  ;;  %v72_v22 = vld [vmem:[#allocation2 + $0x18] sm:$0xff]  ;;  %v71_v24 = vld [vmem:[#allocation2 + $0x10] sm:$0xff]  ;;  %v176_v25 = vld [vmem:[#allocation4 + $0x28] sm:$0xff] }
  0x2d   :  { %442 = vmatprep.subr.mxu0 %v80_v5  ;;  %474 = vmatpush3.msra.mxu1 %v184_v9  ;;  %v70_v26 = vld [vmem:[#allocation2 + $0x8] sm:$0xff]  ;;  %v69_v27 = vld [vmem:[#allocation2] sm:$0xff]  ;;  %v174_v30 = vld [vmem:[#allocation4 + $0x18] sm:$0xff] }
  0x2e   :  { %443 = vmatpush3.msra.mxu0 %v80_v5  ;;  %475 = vmatprep.subr.mxu1 %v183_v11  ;;  %v671_v28 = vld [vmem:[%s691_s0 + $0x8] sm:$0xff]  ;;  %v175_v29 = vld [vmem:[#allocation4 + $0x20] sm:$0xff]  ;;  %v173_v31 = vld [vmem:[#allocation4 + $0x10] sm:$0xff] }
  0x2f   :  { %444 = vmatprep.subr.mxu0 %v79_v8  ;;  %476 = vmatpush3.msra.mxu1 %v183_v11  ;;  %v172_v32 = vld [vmem:[#allocation4 + $0x8] sm:$0xff]  ;;  %v171_v33 = vld [vmem:[#allocation4] sm:$0xff]  ;;  %v286_v34 = vld [vmem:[#allocation6 + $0x78] sm:$0xff] }
  0x30   :  { %445 = vmatpush3.msra.mxu0 %v79_v8  ;;  %477 = vmatprep.subr.mxu1 %v182_v13  ;;  %v285_v35 = vld [vmem:[#allocation6 + $0x70] sm:$0xff]  ;;  %v284_v36 = vld [vmem:[#allocation6 + $0x68] sm:$0xff]  ;;  %v283_v37 = vld [vmem:[#allocation6 + $0x60] sm:$0xff] }
  0x31   :  { %446 = vmatprep.subr.mxu0 %v78_v10  ;;  %478 = vmatpush3.msra.mxu1 %v182_v13  ;;  %v282_v38 = vld [vmem:[#allocation6 + $0x58] sm:$0xff]  ;;  %v281_v39 = vld [vmem:[#allocation6 + $0x50] sm:$0xff]  ;;  %v280_v40 = vld [vmem:[#allocation6 + $0x48] sm:$0xff] }
  0x32   :  { %447 = vmatpush3.msra.mxu0 %v78_v10  ;;  %479 = vmatprep.subr.mxu1 %v181_v15  ;;  %v279_v41 = vld [vmem:[#allocation6 + $0x40] sm:$0xff]  ;;  %v278_v42 = vld [vmem:[#allocation6 + $0x38] sm:$0xff]  ;;  %v277_v43 = vld [vmem:[#allocation6 + $0x30] sm:$0xff] }
  0x33   :  { %448 = vmatprep.subr.mxu0 %v77_v12  ;;  %480 = vmatpush3.msra.mxu1 %v181_v15  ;;  %v276_v44 = vld [vmem:[#allocation6 + $0x28] sm:$0xff]  ;;  %v275_v45 = vld [vmem:[#allocation6 + $0x20] sm:$0xff]  ;;  %v274_v55 = vld [vmem:[#allocation6 + $0x18] sm:$0xff] }
  0x34   :  { %449 = vmatpush3.msra.mxu0 %v77_v12  ;;  %481 = vmatprep.subr.mxu1 %v180_v17  ;;  %v377_v46 = vld [vmem:[%s693_s2] ss:$0 sm:$0xff]  ;;  %v273_v56 = vld [vmem:[#allocation6 + $0x10] sm:$0xff]  ;;  %v272_v57 = vld [vmem:[#allocation6 + $0x8] sm:$0xff] }
  0x35   :  { %450 = vmatprep.subr.mxu0 %v76_v14  ;;  %482 = vmatpush3.msra.mxu1 %v180_v17  ;;  %v271_v58 = vld [vmem:[#allocation6] sm:$0xff] }
  0x36   :  { %451 = vmatpush3.msra.mxu0 %v76_v14  ;;  %483 = vmatprep.subr.mxu1 %v179_v19  ;;  %v378_v59 = vld [vmem:[%s695_s4] ss:$0 sm:$0xff] }
  0x37   :  { %452 = vmatprep.subr.mxu0 %v75_v16  ;;  %484 = vmatpush3.msra.mxu1 %v179_v19  ;;  %v379_v2 = vld [vmem:[%s697_s6] ss:$0 sm:$0xff] }
  0x38   :  { %453 = vmatpush3.msra.mxu0 %v75_v16  ;;  %485 = vmatprep.subr.mxu1 %v178_v21 }
  0x39   :  { %454 = vmatprep.subr.mxu0 %v74_v18  ;;  %486 = vmatpush3.msra.mxu1 %v178_v21 }
  0x3a   :  { %455 = vmatpush3.msra.mxu0 %v74_v18  ;;  %487 = vmatprep.subr.mxu1 %v177_v23 }
  0x3b   :  { %456 = vmatprep.subr.mxu0 %v73_v20  ;;  %488 = vmatpush3.msra.mxu1 %v177_v23 }
  0x3c   :  { %457 = vmatpush3.msra.mxu0 %v73_v20  ;;  %489 = vmatprep.subr.mxu1 %v176_v25 }
  0x3d   :  { %458 = vmatprep.subr.mxu0 %v72_v22  ;;  %490 = vmatpush3.msra.mxu1 %v176_v25 }
  0x3e   :  { %459 = vmatpush3.msra.mxu0 %v72_v22  ;;  %491 = vmatprep.subr.mxu1 %v175_v29 }
  0x3f   :  { %460 = vmatprep.subr.mxu0 %v71_v24  ;;  %492 = vmatpush3.msra.mxu1 %v175_v29 }
  0x40   :  { %461 = vmatpush3.msra.mxu0 %v71_v24  ;;  %493 = vmatprep.subr.mxu1 %v174_v30 }
  0x41   :  { %462 = vmatprep.subr.mxu0 %v70_v26  ;;  %494 = vmatpush3.msra.mxu1 %v174_v30 }
  0x42   :  { %463 = vmatpush3.msra.mxu0 %v70_v26  ;;  %495 = vmatprep.subr.mxu1 %v173_v31 }
  0x43   :  { %464 = vmatprep.subr.mxu0 %v69_v27  ;;  %496 = vmatpush3.msra.mxu1 %v173_v31 }
  0x44   :  { %465 = vmatpush3.msra.mxu0 %v69_v27  ;;  %497 = vmatprep.subr.mxu1 %v172_v32 }
  0x45   :  { %467 = vmatmul.mubr.f32.vlgmr.msra.gmra.mxu0 %v671_v28  ;;  %498 = vmatpush3.msra.mxu1 %v172_v32 }
  0x46   :  { %499 = vmatprep.subr.mxu1 %v171_v33  ;;  %504 = vmatprep.subr.mxu0 %v286_v34 }
  0x47   :  { %500 = vmatpush3.msra.mxu1 %v171_v33  ;;  %505 = vmatpush3.msra.mxu0 %v286_v34 }
  0x48   :  { %506 = vmatprep.subr.mxu0 %v285_v35 }
  0x49   :  { %507 = vmatpush3.msra.mxu0 %v285_v35 }
  0x4a   :  { %508 = vmatprep.subr.mxu0 %v284_v36 }
  0x4b   :  { %509 = vmatpush3.msra.mxu0 %v284_v36 }
  0x4c   :  { %510 = vmatprep.subr.mxu0 %v283_v37 }
  0x4d   :  { %511 = vmatpush3.msra.mxu0 %v283_v37 }
  0x4e   :  { %512 = vmatprep.subr.mxu0 %v282_v38 }
  0x4f   :  { %513 = vmatpush3.msra.mxu0 %v282_v38 }
  0x50   :  { %514 = vmatprep.subr.mxu0 %v281_v39 }
  0x51   :  { %515 = vmatpush3.msra.mxu0 %v281_v39 }
  0x52   :  { %516 = vmatprep.subr.mxu0 %v280_v40 }
  0x53   :  { %517 = vmatpush3.msra.mxu0 %v280_v40 }
  0x54   :  { %518 = vmatprep.subr.mxu0 %v279_v41 }
  0x55   :  { %519 = vmatpush3.msra.mxu0 %v279_v41 }
  0x56   :  { %520 = vmatprep.subr.mxu0 %v278_v42 }
  0x57   :  { %521 = vmatpush3.msra.mxu0 %v278_v42 }
  0x58   :  { %522 = vmatprep.subr.mxu0 %v277_v43 }
  0x59   :  { %523 = vmatpush3.msra.mxu0 %v277_v43 }
  0x5a   :  { %524 = vmatprep.subr.mxu0 %v276_v44 }
  0x5b   :  { %525 = vmatpush3.msra.mxu0 %v276_v44 }
  0x5c   :  { %526 = vmatprep.subr.mxu0 %v275_v45 }
  0x5d   :  { %527 = vmatpush3.msra.mxu0 %v275_v45 }
  0x5e   :  { %528 = vmatprep.subr.mxu0 %v274_v55 }
  0x5f   :  { %529 = vmatpush3.msra.mxu0 %v274_v55 }
  0x60   :  { %530 = vmatprep.subr.mxu0 %v273_v56 }
  0x61   :  { %531 = vmatpush3.msra.mxu0 %v273_v56 }
  0x62   :  { %532 = vmatprep.subr.mxu0 %v272_v57 }
  0x63   :  { %533 = vmatpush3.msra.mxu0 %v272_v57 }
  0x64   :  { %534 = vmatprep.subr.mxu0 %v271_v58 }
  0x65   :  { %535 = vmatpush3.msra.mxu0 %v271_v58 }
 0x105   :  { %v468_v47 = vpop.f32.mrf.mxu0 }
 0x106   :  { %v164_v48 = vadd.f32 %v468_v47, %v377_v46 }
 0x107   :  { %v158_v49 = vpop.f32.mrf.mxu0 }
 0x108   :  { %v159_v50 = vadd.f32 %v377_v46, %v158_v49  ;;  %v168_v51 = vmax.f32 %v164_v48, 0.0 }
 0x10a   :  { %v167_v52 = vmax.f32 %v159_v50, 0.0  ;;  %v170_v54 = vadd.f32 %v168_v51, %v671_v28 }
 0x10c   :  { %v169_v53 = vadd.f32 %v167_v52, %v665_v4 }
 0x10e   :  { %501 = vmatprep.mubr.f32.mxu1 %v169_v53 }
 0x10f   :  { %502 = vmatmul.mubr.f32.vlgmr.msra.gmra.mxu1 %v170_v54 }
 0x1cf   :  { %v503_v60 = vpop.f32.mrf.mxu1 }
 0x1d0   :  { %v266_v61 = vadd.f32 %v503_v60, %v378_v59 }
 0x1d1   :  { %v260_v62 = vpop.f32.mrf.mxu1 }
 0x1d2   :  { %v261_v63 = vadd.f32 %v378_v59, %v260_v62  ;;  %v270_v1 = vmax.f32 %v266_v61, 0.0 }
 0x1d4   :  { %v269_v0 = vmax.f32 %v261_v63, 0.0 }
 0x1d6   :  { %536 = vmatprep.mubr.f32.mxu0 %v269_v0 }
 0x1d7   :  { %537 = vmatmul.mubr.f32.vlgmr.msra.gmra.mxu0 %v270_v1 }
 0x297   :  { %v538_v3 = vpop.f32.mrf.mxu0 }
 0x298   :  { %v366_v4 = vadd.f32 %v538_v3, %v379_v2 }
 0x299   :  { %v360_v5 = vpop.f32.mrf.mxu0 }
 0x29a   :  { %370 = vst [vmem:[%s698_s7 + $0x8] sm:$0xff] %v366_v4  ;;  %v361_v6 = vadd.f32 %v379_v2, %v360_v5 }
 0x29c   :  { %369 = vst [vmem:[%s698_s7] sm:$0xff] %v361_v6 }
 0x29d   :  { %375 = vsyncpa [#allocation3], 1 }
 0x29e   :  { %376 = vsyncpa [#allocation5], 1 }

// kernel: _sparknet_forward_impl.1
= control target key start
LH: loop header
LB: loop body
LE: loop exit
PB: predicated region body
PF: predicated region fallthrough
CT: control target
= control target key end

     0   :  { %12 = vsyncpa [#allocation3], 0  ;;  %s691_s0 = inlined_call_operand.vmem [shape: f32[16,128], index: 0, kind: input, shape index: {}]   ;;  %s692_s1 = inlined_call_operand.hbm [shape: f32[128,128], index: 1, kind: input, shape index: {}]   ;;  %s693_s2 = inlined_call_operand.vmem [shape: f32[1,128], index: 2, kind: input, shape index: {}]   ;;  %s694_s3 = inlined_call_operand.hbm [shape: f32[128,128], index: 3, kind: input, shape index: {}]   ;;  %s695_s4 = inlined_call_operand.vmem [shape: f32[1,128], index: 4, kind: input, shape index: {}]   ;;  %s696_s5 = inlined_call_operand.hbm [shape: f32[128,128], index: 5, kind: input, shape index: {}]   ;;  %s697_s6 = inlined_call_operand.vmem [shape: f32[1,128], index: 6, kind: input, shape index: {}]   ;;  %s698_s7 = inlined_call_operand.vmem [shape: f32[16,128], index: 7, kind: output, shape index: {}]  }
   0x1   :  { %13 = vsyncpa [#allocation5], 0  ;;  %s608_s24 = smov [#allocation4]   ;;  %s609_s26 = smov [#allocation2]  }
   0x2   :  { %s35_s25 = sshll.u32 %s608_s24, 4  ;;  %s21_s27 = sshll.u32 %s609_s26, 4  ;;  %s36_s25 = int_to_ptr.vmem [resolvable:$true] %s35_s25  ;;  %s22_s27 = int_to_ptr.vmem [resolvable:$true] %s21_s27 }
   0x3   :  { %s552_s28 = scalar_lea.vmem %s36_s25, 2048  ;;  %p557_p1 = scmp.lt.s32.totalorder %s36_s25, %s36_s25 }
   0x4   :  { %p553_p0 = scmp.ne.s32.totalorder %s36_s25, %s552_s28  ;;  %p558_p2 = scmp.lt.s32.totalorder %s552_s28, %s552_s28 }
   0x6   :  { %p559_p3 = por %p558_p2, %p557_p1 }
   0x8   :  { %p560_p4 = pnand %p559_p3, %p553_p0 }
   0xa   :  { %563 = shalt.err (!%p560_p4)
}
   0xb   :  { %s610_s29 = smov 128   ;;  %s611_s30 = smov 8  }
   0xc   :  { %41 = dma.hbm_to_vmem [thread:$0]  %s694_s3, 2048, %s36_s25, [#allocation5], %s610_s29, %s610_s29, %s611_s30  }
   0xd   :  { %s572_s10 = scalar_lea.vmem %s22_s27, 2048  ;;  %p577_p6 = scmp.lt.s32.totalorder %s22_s27, %s22_s27 }
   0xe   :  { %p573_p5 = scmp.ne.s32.totalorder %s22_s27, %s572_s10  ;;  %p578_p7 = scmp.lt.s32.totalorder %s572_s10, %s572_s10 }
  0x10   :  { %p579_p8 = por %p578_p7, %p577_p6 }
  0x12   :  { %p580_p9 = pnand %p579_p8, %p573_p5 }
  0x14   :  { %583 = shalt.err (!%p580_p9)
}
  0x15   :  { %27 = dma.hbm_to_vmem [thread:$0]  %s692_s1, 2048, %s22_s27, [#allocation3], %s610_s29, %s610_s29, %s611_s30  }
  0x16   :  { %s612_s13 = smov [#allocation6]  }
  0x17   :  { %s49_s14 = sshll.u32 %s612_s13, 4  ;;  %s50_s14 = int_to_ptr.vmem [resolvable:$true] %s49_s14 }
  0x18   :  { %s592_s15 = scalar_lea.vmem %s50_s14, 2048  ;;  %p597_p11 = scmp.lt.s32.totalorder %s50_s14, %s50_s14 }
  0x19   :  { %p593_p10 = scmp.ne.s32.totalorder %s50_s14, %s592_s15  ;;  %p598_p12 = scmp.lt.s32.totalorder %s592_s15, %s592_s15 }
  0x1b   :  { %p599_p13 = por %p598_p12, %p597_p11 }
  0x1d   :  { %p600_p0 = pnand %p599_p13, %p593_p10 }
  0x1f   :  { %603 = shalt.err (!%p600_p0)
}
  0x20   :  { %55 = dma.hbm_to_vmem [thread:$0]  %s696_s5, 2048, %s50_s14, [#allocation5], %s610_s29, %s610_s29, %s611_s30  }
  0x21   :  { %604 = dma.done.wait [#allocation3], 2048  }
  0x22   :  { %605 = vsyncadd [#allocation3], 4294965248 }
  0x23   :  { %606 = dma.done.wait [#allocation5], 4096  }
  0x24   :  { %607 = vsyncadd [#allocation5], 4294963200  ;;  %v84_v0 = vld [vmem:[#allocation2 + $0x78] sm:$0xff]  ;;  %v83_v1 = vld [vmem:[#allocation2 + $0x70] sm:$0xff] }
  0x25   :  { %434 = vmatprep.subr.mxu0 %v84_v0  ;;  %v82_v2 = vld [vmem:[#allocation2 + $0x68] sm:$0xff]  ;;  %v81_v3 = vld [vmem:[#allocation2 + $0x60] sm:$0xff]  ;;  %v80_v5 = vld [vmem:[#allocation2 + $0x58] sm:$0xff] }
  0x26   :  { %435 = vmatpush3.msra.mxu0 %v84_v0  ;;  %v665_v4 = vld [vmem:[%s691_s0] sm:$0xff]  ;;  %v186_v6 = vld [vmem:[#allocation4 + $0x78] sm:$0xff]  ;;  %v185_v7 = vld [vmem:[#allocation4 + $0x70] sm:$0xff] }
  0x27   :  { %436 = vmatprep.subr.mxu0 %v83_v1  ;;  %466 = vmatprep.mubr.f32.mxu0 %v665_v4  ;;  %v79_v8 = vld [vmem:[#allocation2 + $0x50] sm:$0xff]  ;;  %v184_v9 = vld [vmem:[#allocation4 + $0x68] sm:$0xff]  ;;  %v183_v11 = vld [vmem:[#allocation4 + $0x60] sm:$0xff] }
  0x28   :  { %437 = vmatpush3.msra.mxu0 %v83_v1  ;;  %469 = vmatprep.subr.mxu1 %v186_v6  ;;  %v78_v10 = vld [vmem:[#allocation2 + $0x48] sm:$0xff]  ;;  %v77_v12 = vld [vmem:[#allocation2 + $0x40] sm:$0xff]  ;;  %v182_v13 = vld [vmem:[#allocation4 + $0x58] sm:$0xff] }
  0x29   :  { %438 = vmatprep.subr.mxu0 %v82_v2  ;;  %470 = vmatpush3.msra.mxu1 %v186_v6  ;;  %v76_v14 = vld [vmem:[#allocation2 + $0x38] sm:$0xff]  ;;  %v181_v15 = vld [vmem:[#allocation4 + $0x50] sm:$0xff]  ;;  %v180_v17 = vld [vmem:[#allocation4 + $0x48] sm:$0xff] }
  0x2a   :  { %439 = vmatpush3.msra.mxu0 %v82_v2  ;;  %471 = vmatprep.subr.mxu1 %v185_v7  ;;  %v75_v16 = vld [vmem:[#allocation2 + $0x30] sm:$0xff]  ;;  %v74_v18 = vld [vmem:[#allocation2 + $0x28] sm:$0xff]  ;;  %v179_v19 = vld [vmem:[#allocation4 + $0x40] sm:$0xff] }
  0x2b   :  { %440 = vmatprep.subr.mxu0 %v81_v3  ;;  %472 = vmatpush3.msra.mxu1 %v185_v7  ;;  %v73_v20 = vld [vmem:[#allocation2 + $0x20] sm:$0xff]  ;;  %v178_v21 = vld [vmem:[#allocation4 + $0x38] sm:$0xff]  ;;  %v177_v23 = vld [vmem:[#allocation4 + $0x30] sm:$0xff] }
  0x2c   :  { %441 = vmatpush3.msra.mxu0 %v81_v3  ;;  %473 = vmatprep.subr.mxu1 %v184_v9  ;;  %v72_v22 = vld [vmem:[#allocation2 + $0x18] sm:$0xff]  ;;  %v71_v24 = vld [vmem:[#allocation2 + $0x10] sm:$0xff]  ;;  %v176_v25 = vld [vmem:[#allocation4 + $0x28] sm:$0xff] }
  0x2d   :  { %442 = vmatprep.subr.mxu0 %v80_v5  ;;  %474 = vmatpush3.msra.mxu1 %v184_v9  ;;  %v70_v26 = vld [vmem:[#allocation2 + $0x8] sm:$0xff]  ;;  %v69_v27 = vld [vmem:[#allocation2] sm:$0xff]  ;;  %v174_v30 = vld [vmem:[#allocation4 + $0x18] sm:$0xff] }
  0x2e   :  { %443 = vmatpush3.msra.mxu0 %v80_v5  ;;  %475 = vmatprep.subr.mxu1 %v183_v11  ;;  %v671_v28 = vld [vmem:[%s691_s0 + $0x8] sm:$0xff]  ;;  %v175_v29 = vld [vmem:[#allocation4 + $0x20] sm:$0xff]  ;;  %v173_v31 = vld [vmem:[#allocation4 + $0x10] sm:$0xff] }
  0x2f   :  { %444 = vmatprep.subr.mxu0 %v79_v8  ;;  %476 = vmatpush3.msra.mxu1 %v183_v11  ;;  %v172_v32 = vld [vmem:[#allocation4 + $0x8] sm:$0xff]  ;;  %v171_v33 = vld [vmem:[#allocation4] sm:$0xff]  ;;  %v286_v34 = vld [vmem:[#allocation6 + $0x78] sm:$0xff] }
  0x30   :  { %445 = vmatpush3.msra.mxu0 %v79_v8  ;;  %477 = vmatprep.subr.mxu1 %v182_v13  ;;  %v285_v35 = vld [vmem:[#allocation6 + $0x70] sm:$0xff]  ;;  %v284_v36 = vld [vmem:[#allocation6 + $0x68] sm:$0xff]  ;;  %v283_v37 = vld [vmem:[#allocation6 + $0x60] sm:$0xff] }
  0x31   :  { %446 = vmatprep.subr.mxu0 %v78_v10  ;;  %478 = vmatpush3.msra.mxu1 %v182_v13  ;;  %v282_v38 = vld [vmem:[#allocation6 + $0x58] sm:$0xff]  ;;  %v281_v39 = vld [vmem:[#allocation6 + $0x50] sm:$0xff]  ;;  %v280_v40 = vld [vmem:[#allocation6 + $0x48] sm:$0xff] }
  0x32   :  { %447 = vmatpush3.msra.mxu0 %v78_v10  ;;  %479 = vmatprep.subr.mxu1 %v181_v15  ;;  %v279_v41 = vld [vmem:[#allocation6 + $0x40] sm:$0xff]  ;;  %v278_v42 = vld [vmem:[#allocation6 + $0x38] sm:$0xff]  ;;  %v277_v43 = vld [vmem:[#allocation6 + $0x30] sm:$0xff] }
  0x33   :  { %448 = vmatprep.subr.mxu0 %v77_v12  ;;  %480 = vmatpush3.msra.mxu1 %v181_v15  ;;  %v276_v44 = vld [vmem:[#allocation6 + $0x28] sm:$0xff]  ;;  %v275_v45 = vld [vmem:[#allocation6 + $0x20] sm:$0xff]  ;;  %v274_v55 = vld [vmem:[#allocation6 + $0x18] sm:$0xff] }
  0x34   :  { %449 = vmatpush3.msra.mxu0 %v77_v12  ;;  %481 = vmatprep.subr.mxu1 %v180_v17  ;;  %v377_v46 = vld [vmem:[%s693_s2] ss:$0 sm:$0xff]  ;;  %v273_v56 = vld [vmem:[#allocation6 + $0x10] sm:$0xff]  ;;  %v272_v57 = vld [vmem:[#allocation6 + $0x8] sm:$0xff] }
  0x35   :  { %450 = vmatprep.subr.mxu0 %v76_v14  ;;  %482 = vmatpush3.msra.mxu1 %v180_v17  ;;  %v271_v58 = vld [vmem:[#allocation6] sm:$0xff] }
  0x36   :  { %451 = vmatpush3.msra.mxu0 %v76_v14  ;;  %483 = vmatprep.subr.mxu1 %v179_v19  ;;  %v378_v59 = vld [vmem:[%s695_s4] ss:$0 sm:$0xff] }
  0x37   :  { %452 = vmatprep.subr.mxu0 %v75_v16  ;;  %484 = vmatpush3.msra.mxu1 %v179_v19  ;;  %v379_v2 = vld [vmem:[%s697_s6] ss:$0 sm:$0xff] }
  0x38   :  { %453 = vmatpush3.msra.mxu0 %v75_v16  ;;  %485 = vmatprep.subr.mxu1 %v178_v21 }
  0x39   :  { %454 = vmatprep.subr.mxu0 %v74_v18  ;;  %486 = vmatpush3.msra.mxu1 %v178_v21 }
  0x3a   :  { %455 = vmatpush3.msra.mxu0 %v74_v18  ;;  %487 = vmatprep.subr.mxu1 %v177_v23 }
  0x3b   :  { %456 = vmatprep.subr.mxu0 %v73_v20  ;;  %488 = vmatpush3.msra.mxu1 %v177_v23 }
  0x3c   :  { %457 = vmatpush3.msra.mxu0 %v73_v20  ;;  %489 = vmatprep.subr.mxu1 %v176_v25 }
  0x3d   :  { %458 = vmatprep.subr.mxu0 %v72_v22  ;;  %490 = vmatpush3.msra.mxu1 %v176_v25 }
  0x3e   :  { %459 = vmatpush3.msra.mxu0 %v72_v22  ;;  %491 = vmatprep.subr.mxu1 %v175_v29 }
  0x3f   :  { %460 = vmatprep.subr.mxu0 %v71_v24  ;;  %492 = vmatpush3.msra.mxu1 %v175_v29 }
  0x40   :  { %461 = vmatpush3.msra.mxu0 %v71_v24  ;;  %493 = vmatprep.subr.mxu1 %v174_v30 }
  0x41   :  { %462 = vmatprep.subr.mxu0 %v70_v26  ;;  %494 = vmatpush3.msra.mxu1 %v174_v30 }
  0x42   :  { %463 = vmatpush3.msra.mxu0 %v70_v26  ;;  %495 = vmatprep.subr.mxu1 %v173_v31 }
  0x43   :  { %464 = vmatprep.subr.mxu0 %v69_v27  ;;  %496 = vmatpush3.msra.mxu1 %v173_v31 }
  0x44   :  { %465 = vmatpush3.msra.mxu0 %v69_v27  ;;  %497 = vmatprep.subr.mxu1 %v172_v32 }
  0x45   :  { %467 = vmatmul.mubr.f32.vlgmr.msra.gmra.mxu0 %v671_v28  ;;  %498 = vmatpush3.msra.mxu1 %v172_v32 }
  0x46   :  { %499 = vmatprep.subr.mxu1 %v171_v33  ;;  %504 = vmatprep.subr.mxu0 %v286_v34 }
  0x47   :  { %500 = vmatpush3.msra.mxu1 %v171_v33  ;;  %505 = vmatpush3.msra.mxu0 %v286_v34 }
  0x48   :  { %506 = vmatprep.subr.mxu0 %v285_v35 }
  0x49   :  { %507 = vmatpush3.msra.mxu0 %v285_v35 }
  0x4a   :  { %508 = vmatprep.subr.mxu0 %v284_v36 }
  0x4b   :  { %509 = vmatpush3.msra.mxu0 %v284_v36 }
  0x4c   :  { %510 = vmatprep.subr.mxu0 %v283_v37 }
  0x4d   :  { %511 = vmatpush3.msra.mxu0 %v283_v37 }
  0x4e   :  { %512 = vmatprep.subr.mxu0 %v282_v38 }
  0x4f   :  { %513 = vmatpush3.msra.mxu0 %v282_v38 }
  0x50   :  { %514 = vmatprep.subr.mxu0 %v281_v39 }
  0x51   :  { %515 = vmatpush3.msra.mxu0 %v281_v39 }
  0x52   :  { %516 = vmatprep.subr.mxu0 %v280_v40 }
  0x53   :  { %517 = vmatpush3.msra.mxu0 %v280_v40 }
  0x54   :  { %518 = vmatprep.subr.mxu0 %v279_v41 }
  0x55   :  { %519 = vmatpush3.msra.mxu0 %v279_v41 }
  0x56   :  { %520 = vmatprep.subr.mxu0 %v278_v42 }
  0x57   :  { %521 = vmatpush3.msra.mxu0 %v278_v42 }
  0x58   :  { %522 = vmatprep.subr.mxu0 %v277_v43 }
  0x59   :  { %523 = vmatpush3.msra.mxu0 %v277_v43 }
  0x5a   :  { %524 = vmatprep.subr.mxu0 %v276_v44 }
  0x5b   :  { %525 = vmatpush3.msra.mxu0 %v276_v44 }
  0x5c   :  { %526 = vmatprep.subr.mxu0 %v275_v45 }
  0x5d   :  { %527 = vmatpush3.msra.mxu0 %v275_v45 }
  0x5e   :  { %528 = vmatprep.subr.mxu0 %v274_v55 }
  0x5f   :  { %529 = vmatpush3.msra.mxu0 %v274_v55 }
  0x60   :  { %530 = vmatprep.subr.mxu0 %v273_v56 }
  0x61   :  { %531 = vmatpush3.msra.mxu0 %v273_v56 }
  0x62   :  { %532 = vmatprep.subr.mxu0 %v272_v57 }
  0x63   :  { %533 = vmatpush3.msra.mxu0 %v272_v57 }
  0x64   :  { %534 = vmatprep.subr.mxu0 %v271_v58 }
  0x65   :  { %535 = vmatpush3.msra.mxu0 %v271_v58 }
 0x105   :  { %v468_v47 = vpop.f32.mrf.mxu0 }
 0x106   :  { %v164_v48 = vadd.f32 %v468_v47, %v377_v46 }
 0x107   :  { %v158_v49 = vpop.f32.mrf.mxu0 }
 0x108   :  { %v159_v50 = vadd.f32 %v377_v46, %v158_v49  ;;  %v168_v51 = vmax.f32 %v164_v48, 0.0 }
 0x10a   :  { %v167_v52 = vmax.f32 %v159_v50, 0.0  ;;  %v170_v54 = vadd.f32 %v168_v51, %v671_v28 }
 0x10c   :  { %v169_v53 = vadd.f32 %v167_v52, %v665_v4 }
 0x10e   :  { %501 = vmatprep.mubr.f32.mxu1 %v169_v53 }
 0x10f   :  { %502 = vmatmul.mubr.f32.vlgmr.msra.gmra.mxu1 %v170_v54 }
 0x1cf   :  { %v503_v60 = vpop.f32.mrf.mxu1 }
 0x1d0   :  { %v266_v61 = vadd.f32 %v503_v60, %v378_v59 }
 0x1d1   :  { %v260_v62 = vpop.f32.mrf.mxu1 }
 0x1d2   :  { %v261_v63 = vadd.f32 %v378_v59, %v260_v62  ;;  %v270_v1 = vmax.f32 %v266_v61, 0.0 }
 0x1d4   :  { %v269_v0 = vmax.f32 %v261_v63, 0.0 }
 0x1d6   :  { %536 = vmatprep.mubr.f32.mxu0 %v269_v0 }
 0x1d7   :  { %537 = vmatmul.mubr.f32.vlgmr.msra.gmra.mxu0 %v270_v1 }
 0x297   :  { %v538_v3 = vpop.f32.mrf.mxu0 }
 0x298   :  { %v366_v4 = vadd.f32 %v538_v3, %v379_v2 }
 0x299   :  { %v360_v5 = vpop.f32.mrf.mxu0 }
 0x29a   :  { %370 = vst [vmem:[%s698_s7 + $0x8] sm:$0xff] %v366_v4  ;;  %v361_v6 = vadd.f32 %v379_v2, %v360_v5 }
 0x29c   :  { %369 = vst [vmem:[%s698_s7] sm:$0xff] %v361_v6 }
 0x29d   :  { %375 = vsyncpa [#allocation3], 1 }
 0x29e   :  { %376 = vsyncpa [#allocation5], 1 }

</bundles_post_ra>
